<compile_context>
chip_gen: v6e
topology: v6e:2x2x1
jax: 0.10.0
libtpu: 0.0.40
codegen_flags: <defaults>
</compile_context>

<pallas_src>
import math

import jax
import jax.numpy as jnp
from jax.experimental import pallas as pl
from jax.experimental.pallas import tpu as pltpu

# ----------------------------- config (small) -------------------------------
BATCH = 2
SEQ = 8
D_MODEL = 32
N_HEADS = 4
D_KV = 8
INNER = N_HEADS * D_KV            # 32
NUM_BUCKETS = 32
MAX_DISTANCE = 128
IS_DECODER = False                # bidirectional relative attention buckets
LN_EPS = 1e-6
BS = BATCH * SEQ                  # 16
N_BH = N_HEADS * BATCH            # 8 batched (head, batch) attention problems


# ----------------------- relative position bias (glue) ----------------------
def _relative_position_bucket(relative_position, bidirectional=True,
                              num_buckets=32, max_distance=128):
    relative_buckets = jnp.zeros_like(relative_position)
    if bidirectional:
        num_buckets //= 2
        relative_buckets = relative_buckets + (relative_position > 0).astype(jnp.int32) * num_buckets
        relative_position = jnp.abs(relative_position)
    else:
        relative_position = -jnp.minimum(relative_position, jnp.zeros_like(relative_position))
    max_exact = num_buckets // 2
    is_small = relative_position < max_exact
    rel_pos_f = jnp.maximum(relative_position.astype(jnp.float32), 1e-20)  # avoid log(0); masked anyway
    relative_position_if_large = max_exact + (
        jnp.log(rel_pos_f / max_exact) / math.log(max_distance / max_exact)
        * (num_buckets - max_exact)
    ).astype(jnp.int32)
    relative_position_if_large = jnp.minimum(relative_position_if_large, num_buckets - 1)
    relative_buckets = relative_buckets + jnp.where(is_small, relative_position,
                                                    relative_position_if_large)
    return relative_buckets


def compute_position_bias(rel_emb, query_length, key_length):
    """rel_emb: [num_buckets, n_heads] -> bias [1, H, q_len, k_len]."""
    context_position = jnp.arange(query_length, dtype=jnp.int32)[:, None]
    memory_position = jnp.arange(key_length, dtype=jnp.int32)[None, :]
    relative_position = memory_position - context_position
    buckets = _relative_position_bucket(
        relative_position, bidirectional=not IS_DECODER,
        num_buckets=NUM_BUCKETS, max_distance=MAX_DISTANCE)
    values = rel_emb[buckets]                        # (q, k, H)
    values = jnp.transpose(values, (2, 0, 1))[None]  # (1, H, q, k)
    return values


# ------------------------------- Pallas kernel -------------------------------
def layer_self_attn_kernel(h_ref, ln_w_ref, wqkv_t_ref, wo_t_ref, pb_ref, o_ref):
    # h_ref: (BS, D); ln_w_ref: (1, D); wqkv_t_ref: (D, 3*INNER) cols = (q|k|v, head-major)
    # wo_t_ref: (INNER, D) rows head-major; pb_ref: (N_BH, S, S) with n = head*B + b.
    h = h_ref[...].astype(jnp.float32)                                   # (BS, D)

    # ---- LLmPULayerNorm (RMS norm, no mean subtraction) ----
    var = jnp.mean(h * h, axis=-1, keepdims=True)
    normed = (h * jax.lax.rsqrt(var + LN_EPS)) * ln_w_ref[...]           # (BS, D)

    # ---- fused Q/K/V projection: one MXU dispatch, weight pre-transposed ----
    # TODO(synk): at real sizes cast normed/weights to bf16 here (keep f32 accumulation).
    qkv = jnp.dot(normed, wqkv_t_ref[...],
                  preferred_element_type=jnp.float32)                    # (BS, 3*INNER)

    # ---- gather all heads into one leading batch dim: (N_BH, S, D_KV), n = head*B + b ----
    def head_batched(base):
        parts = [
            qkv[:, base + head * D_KV: base + (head + 1) * D_KV].reshape(BATCH, SEQ, D_KV)
            for head in range(N_HEADS)
        ]
        return jnp.concatenate(parts, axis=0)                            # (N_BH, S, D_KV)

    q = head_batched(0)
    k = head_batched(INNER)
    v = head_batched(2 * INNER)

    # ---- batched attention over n = head*batch (T5-style: NO 1/sqrt(d_kv) scaling) ----
    scores = jnp.einsum('nqd,nkd->nqk', q, k,
                        preferred_element_type=jnp.float32)              # (N_BH, S, S)
    scores = scores + pb_ref[...]                                        # + relative-position bias
    scores = scores - jnp.max(scores, axis=-1, keepdims=True)
    e = jnp.exp(scores)
    attn = e * pl.reciprocal(jnp.sum(e, axis=-1, keepdims=True), approx=True)
    ctx = jnp.einsum('nqk,nkd->nqd', attn, v,
                     preferred_element_type=jnp.float32)                 # (N_BH, S, D_KV)

    # ---- regroup per-head contexts into (BS, INNER) head-major columns ----
    ctx_all = jnp.concatenate(
        [ctx[head * BATCH:(head + 1) * BATCH].reshape(BS, D_KV) for head in range(N_HEADS)],
        axis=-1)                                                         # (BS, INNER)

    # ---- single output projection + residual (dropout is identity in eval mode) ----
    out = jnp.dot(ctx_all, wo_t_ref[...],
                  preferred_element_type=jnp.float32)                    # (BS, D)
    o_ref[...] = (h + out).astype(o_ref.dtype)


def llmpu_layer_self_attention_pallas(hidden_states, ln_w, wq, wk, wv, wo, position_bias):
    B, S, D = hidden_states.shape
    # Wrapper-side weight / bias prep (hoist outside the per-call jit when this layer
    # is invoked repeatedly in inference -- it is pure constant folding per set of weights).
    wqkv_t = jnp.concatenate([wq, wk, wv], axis=0).T         # (D, 3*INNER)
    wo_t = wo.T                                              # (INNER, D)
    pb_n = jnp.repeat(position_bias[0], B, axis=0)           # (H*B, S, S), n = head*B + b
    ln_w2 = ln_w.reshape(1, D)
    h2 = hidden_states.reshape(B * S, D)                     # free metadata reshape in HBM

    out2 = pl.pallas_call(
        layer_self_attn_kernel,
        out_shape=jax.ShapeDtypeStruct((B * S, D), hidden_states.dtype),
        grid_spec=pltpu.PrefetchScalarGridSpec(
            num_scalar_prefetch=0,
            grid=(1,),
            in_specs=[
                pl.BlockSpec((B * S, D), lambda i: (0, 0)),
                pl.BlockSpec((1, D), lambda i: (0, 0)),
                pl.BlockSpec((D, 3 * INNER), lambda i: (0, 0)),
                pl.BlockSpec((INNER, D), lambda i: (0, 0)),
                pl.BlockSpec((N_HEADS * B, S, S), lambda i: (0, 0, 0)),
            ],
            out_specs=pl.BlockSpec((B * S, D), lambda i: (0, 0)),
        ),
        compiler_params=pltpu.CompilerParams(
            dimension_semantics=("parallel",)),
    )(h2, ln_w2, wqkv_t, wo_t, pb_n)
    return out2.reshape(B, S, D)


# --------------------------- pure-JAX reference -----------------------------
def llmpu_layer_self_attention_ref(hidden_states, ln_w, wq, wk, wv, wo, position_bias):
    B, S, D = hidden_states.shape
    h32 = hidden_states.astype(jnp.float32)
    var = jnp.mean(h32 * h32, axis=-1, keepdims=True)
    normed = ln_w * (h32 * jax.lax.rsqrt(var + LN_EPS))

    q = normed @ wq.T
    k = normed @ wk.T
    v = normed @ wv.T

    def shape(x):  # (B, S, INNER) -> (B, H, S, D_KV)
        return x.reshape(B, S, N_HEADS, D_KV).transpose(0, 2, 1, 3)

    qh, kh, vh = shape(q), shape(k), shape(v)
    scores = jnp.einsum("bhqd,bhkd->bhqk", qh, kh) + position_bias
    attn = jax.nn.softmax(scores.astype(jnp.float32), axis=-1)
    ctx = jnp.einsum("bhqk,bhkd->bhqd", attn, vh)
    ctx = ctx.transpose(0, 2, 1, 3).reshape(B, S, INNER)
    attn_out = ctx @ wo.T
    return hidden_states + attn_out.astype(hidden_states.dtype)


# ---------------------------------- main -------------------------------------
if __name__ == "__main__":
    key = jax.random.PRNGKey(0)
    k_h, k_q, k_k, k_v, k_o, k_e, k_ln = jax.random.split(key, 7)

    hidden = jax.random.normal(k_h, (BATCH, SEQ, D_MODEL), dtype=jnp.float32)
    wq = jax.random.normal(k_q, (INNER, D_MODEL), dtype=jnp.float32) * (D_MODEL * D_KV) ** -0.5
    wk = jax.random.normal(k_k, (INNER, D_MODEL), dtype=jnp.float32) * D_MODEL ** -0.5
    wv = jax.random.normal(k_v, (INNER, D_MODEL), dtype=jnp.float32) * D_MODEL ** -0.5
    wo = jax.random.normal(k_o, (D_MODEL, INNER), dtype=jnp.float32) * INNER ** -0.5
    rel_emb = jax.random.normal(k_e, (NUM_BUCKETS, N_HEADS), dtype=jnp.float32) * D_MODEL ** -0.5
    ln_w = 1.0 + 0.1 * jax.random.normal(k_ln, (D_MODEL,), dtype=jnp.float32)

    position_bias = compute_position_bias(rel_emb, SEQ, SEQ)  # (1, H, S, S)

    out = llmpu_layer_self_attention_pallas(hidden, ln_w, wq, wk, wv, wo, position_bias)
    out = jax.block_until_ready(out)

    ref = llmpu_layer_self_attention_ref(hidden, ln_w, wq, wk, wv, wo, position_bias)
    assert out.shape == (BATCH, SEQ, D_MODEL)
    # approx=True reciprocal in the softmax denominator => allow ~1e-3-level deviation.
    # Use approx=False (exact divide) if bit-level parity with the PyTorch layer matters.
    assert jnp.allclose(out, ref, atol=5e-3, rtol=5e-3), "Pallas output mismatch vs reference"

    print("KERNEL_OK")
</pallas_src>

<mosaic_0001>
module attributes {stable_mosaic.version = 11 : i64} {
  func.func @layer_self_attn_kernel(%arg0: i32, %arg1: memref<16x32xf32, #tpu.memory_space<vmem>>, %arg2: memref<1x32xf32, #tpu.memory_space<vmem>>, %arg3: memref<32x96xf32, #tpu.memory_space<vmem>>, %arg4: memref<32x32xf32, #tpu.memory_space<vmem>>, %arg5: memref<8x8x8xf32, #tpu.memory_space<vmem>>, %arg6: memref<16x32xf32, #tpu.memory_space<vmem>>) attributes {dimension_semantics = [#tpu.dimension_semantics<parallel>], iteration_bounds = array<i64: 1>, scalar_prefetch = 0 : i64, scratch_operands = 0 : i64, tpu.core_type = #tpu.core_type<tc>, window_params = [{pipeline_mode = #tpu.pipeline_mode<synchronous>, transform_indices = @transform_0, window_bounds = array<i64: 16, 32>}, {pipeline_mode = #tpu.pipeline_mode<synchronous>, transform_indices = @transform_1, window_bounds = array<i64: 1, 32>}, {pipeline_mode = #tpu.pipeline_mode<synchronous>, transform_indices = @transform_2, window_bounds = array<i64: 32, 96>}, {pipeline_mode = #tpu.pipeline_mode<synchronous>, transform_indices = @transform_3, window_bounds = array<i64: 32, 32>}, {pipeline_mode = #tpu.pipeline_mode<synchronous>, transform_indices = @transform_4, window_bounds = array<i64: 8, 8, 8>}, {pipeline_mode = #tpu.pipeline_mode<synchronous>, transform_indices = @transform_5, window_bounds = array<i64: 16, 32>}]} {
    %c0 = arith.constant 0 : index
    %c0_0 = arith.constant 0 : index
    %0 = vector.load %arg1[%c0, %c0_0] : memref<16x32xf32, #tpu.memory_space<vmem>>, vector<16x32xf32>
    %1 = arith.mulf %0, %0 : vector<16x32xf32>
    %cst = arith.constant dense<0.000000e+00> : vector<16xf32>
    %2 = vector.multi_reduction <add>, %1, %cst [1] : vector<16x32xf32> to vector<16xf32>
    %3 = vector.shape_cast %2 : vector<16xf32> to vector<16x1xf32>
    %cst_1 = arith.constant 3.200000e+01 : f32
    %4 = vector.broadcast %cst_1 : f32 to vector<16x1xf32>
    %5 = arith.divf %3, %4 : vector<16x1xf32>
    %cst_2 = arith.constant 9.99999997E-7 : f32
    %6 = vector.broadcast %cst_2 : f32 to vector<16x1xf32>
    %7 = arith.addf %5, %6 : vector<16x1xf32>
    %8 = math.rsqrt %7 : vector<16x1xf32>
    %9 = vector.broadcast %8 : vector<16x1xf32> to vector<16x32xf32>
    %10 = arith.mulf %0, %9 : vector<16x32xf32>
    %c0_3 = arith.constant 0 : index
    %c0_4 = arith.constant 0 : index
    %11 = vector.load %arg2[%c0_3, %c0_4] : memref<1x32xf32, #tpu.memory_space<vmem>>, vector<1x32xf32>
    %12 = vector.broadcast %11 : vector<1x32xf32> to vector<16x32xf32>
    %13 = arith.mulf %10, %12 : vector<16x32xf32>
    %c0_5 = arith.constant 0 : index
    %c0_6 = arith.constant 0 : index
    %14 = vector.load %arg3[%c0_5, %c0_6] : memref<32x96xf32, #tpu.memory_space<vmem>>, vector<32x96xf32>
    %cst_7 = arith.constant dense<0.000000e+00> : vector<16x96xf32>
    %15 = tpu.matmul %13, %14, %cst_7 {dimension_numbers = #tpu.dot_dimension_numbers<[1], [0], [0], [1], [0, 0, 1, 1], [], []>} : vector<16x32xf32>, vector<32x96xf32>, vector<16x96xf32> -> vector<16x96xf32>
    %16 = vector.extract_strided_slice %15 {offsets = [0, 0], sizes = [16, 8], strides = [1, 1]} : vector<16x96xf32> to vector<16x8xf32>
    %17 = vector.shape_cast %16 : vector<16x8xf32> to vector<2x8x8xf32>
    %18 = vector.extract_strided_slice %15 {offsets = [0, 8], sizes = [16, 8], strides = [1, 1]} : vector<16x96xf32> to vector<16x8xf32>
    %19 = vector.shape_cast %18 : vector<16x8xf32> to vector<2x8x8xf32>
    %20 = vector.extract_strided_slice %15 {offsets = [0, 16], sizes = [16, 8], strides = [1, 1]} : vector<16x96xf32> to vector<16x8xf32>
    %21 = vector.shape_cast %20 : vector<16x8xf32> to vector<2x8x8xf32>
    %22 = vector.extract_strided_slice %15 {offsets = [0, 24], sizes = [16, 8], strides = [1, 1]} : vector<16x96xf32> to vector<16x8xf32>
    %23 = vector.shape_cast %22 : vector<16x8xf32> to vector<2x8x8xf32>
    %24 = tpu.concatenate %17, %19, %21, %23 in 0 : vector<2x8x8xf32>, vector<2x8x8xf32>, vector<2x8x8xf32>, vector<2x8x8xf32> -> vector<8x8x8xf32>
    %25 = vector.extract_strided_slice %15 {offsets = [0, 32], sizes = [16, 8], strides = [1, 1]} : vector<16x96xf32> to vector<16x8xf32>
    %26 = vector.shape_cast %25 : vector<16x8xf32> to vector<2x8x8xf32>
    %27 = vector.extract_strided_slice %15 {offsets = [0, 40], sizes = [16, 8], strides = [1, 1]} : vector<16x96xf32> to vector<16x8xf32>
    %28 = vector.shape_cast %27 : vector<16x8xf32> to vector<2x8x8xf32>
    %29 = vector.extract_strided_slice %15 {offsets = [0, 48], sizes = [16, 8], strides = [1, 1]} : vector<16x96xf32> to vector<16x8xf32>
    %30 = vector.shape_cast %29 : vector<16x8xf32> to vector<2x8x8xf32>
    %31 = vector.extract_strided_slice %15 {offsets = [0, 56], sizes = [16, 8], strides = [1, 1]} : vector<16x96xf32> to vector<16x8xf32>
    %32 = vector.shape_cast %31 : vector<16x8xf32> to vector<2x8x8xf32>
    %33 = tpu.concatenate %26, %28, %30, %32 in 0 : vector<2x8x8xf32>, vector<2x8x8xf32>, vector<2x8x8xf32>, vector<2x8x8xf32> -> vector<8x8x8xf32>
    %34 = vector.extract_strided_slice %15 {offsets = [0, 64], sizes = [16, 8], strides = [1, 1]} : vector<16x96xf32> to vector<16x8xf32>
    %35 = vector.shape_cast %34 : vector<16x8xf32> to vector<2x8x8xf32>
    %36 = vector.extract_strided_slice %15 {offsets = [0, 72], sizes = [16, 8], strides = [1, 1]} : vector<16x96xf32> to vector<16x8xf32>
    %37 = vector.shape_cast %36 : vector<16x8xf32> to vector<2x8x8xf32>
    %38 = vector.extract_strided_slice %15 {offsets = [0, 80], sizes = [16, 8], strides = [1, 1]} : vector<16x96xf32> to vector<16x8xf32>
    %39 = vector.shape_cast %38 : vector<16x8xf32> to vector<2x8x8xf32>
    %40 = vector.extract_strided_slice %15 {offsets = [0, 88], sizes = [16, 8], strides = [1, 1]} : vector<16x96xf32> to vector<16x8xf32>
    %41 = vector.shape_cast %40 : vector<16x8xf32> to vector<2x8x8xf32>
    %42 = tpu.concatenate %35, %37, %39, %41 in 0 : vector<2x8x8xf32>, vector<2x8x8xf32>, vector<2x8x8xf32>, vector<2x8x8xf32> -> vector<8x8x8xf32>
    "tpu.trace_start"() <{level = 10 : i32, message = "nqd,nkd->nqk"}> : () -> ()
    %cst_8 = arith.constant dense<0.000000e+00> : vector<8x8x8xf32>
    %43 = tpu.matmul %24, %33, %cst_8 {dimension_numbers = #tpu.dot_dimension_numbers<[2], [2], [1], [1], [0, 0, 0, 1, 1, 1], [0], [0]>} : vector<8x8x8xf32>, vector<8x8x8xf32>, vector<8x8x8xf32> -> vector<8x8x8xf32>
    "tpu.trace_stop"() : () -> ()
    %c0_9 = arith.constant 0 : index
    %c0_10 = arith.constant 0 : index
    %c0_11 = arith.constant 0 : index
    %44 = vector.load %arg5[%c0_9, %c0_10, %c0_11] : memref<8x8x8xf32, #tpu.memory_space<vmem>>, vector<8x8x8xf32>
    %45 = arith.addf %43, %44 : vector<8x8x8xf32>
    %cst_12 = arith.constant dense<0xFF800000> : vector<8x8xf32>
    %46 = vector.multi_reduction <maximumf>, %45, %cst_12 [2] : vector<8x8x8xf32> to vector<8x8xf32>
    %47 = vector.shape_cast %46 : vector<8x8xf32> to vector<8x8x1xf32>
    %48 = vector.broadcast %47 : vector<8x8x1xf32> to vector<8x8x8xf32>
    %49 = arith.subf %45, %48 : vector<8x8x8xf32>
    %50 = math.exp %49 : vector<8x8x8xf32>
    %cst_13 = arith.constant dense<0.000000e+00> : vector<8x8xf32>
    %51 = vector.multi_reduction <add>, %50, %cst_13 [2] : vector<8x8x8xf32> to vector<8x8xf32>
    %52 = vector.shape_cast %51 : vector<8x8xf32> to vector<8x8x1xf32>
    %53 = tpu.reciprocal %52 {approx = true} : vector<8x8x1xf32> -> vector<8x8x1xf32>
    %54 = vector.broadcast %53 : vector<8x8x1xf32> to vector<8x8x8xf32>
    %55 = arith.mulf %50, %54 : vector<8x8x8xf32>
    "tpu.trace_start"() <{level = 10 : i32, message = "nqk,nkd->nqd"}> : () -> ()
    %cst_14 = arith.constant dense<0.000000e+00> : vector<8x8x8xf32>
    %56 = tpu.matmul %55, %42, %cst_14 {dimension_numbers = #tpu.dot_dimension_numbers<[2], [1], [1], [2], [0, 0, 0, 1, 1, 2], [0], [0]>} : vector<8x8x8xf32>, vector<8x8x8xf32>, vector<8x8x8xf32> -> vector<8x8x8xf32>
    "tpu.trace_stop"() : () -> ()
    %57 = vector.extract_strided_slice %56 {offsets = [0, 0, 0], sizes = [2, 8, 8], strides = [1, 1, 1]} : vector<8x8x8xf32> to vector<2x8x8xf32>
    %58 = vector.shape_cast %57 : vector<2x8x8xf32> to vector<16x8xf32>
    %59 = vector.extract_strided_slice %56 {offsets = [2, 0, 0], sizes = [2, 8, 8], strides = [1, 1, 1]} : vector<8x8x8xf32> to vector<2x8x8xf32>
    %60 = vector.shape_cast %59 : vector<2x8x8xf32> to vector<16x8xf32>
    %61 = vector.extract_strided_slice %56 {offsets = [4, 0, 0], sizes = [2, 8, 8], strides = [1, 1, 1]} : vector<8x8x8xf32> to vector<2x8x8xf32>
    %62 = vector.shape_cast %61 : vector<2x8x8xf32> to vector<16x8xf32>
    %63 = vector.extract_strided_slice %56 {offsets = [6, 0, 0], sizes = [2, 8, 8], strides = [1, 1, 1]} : vector<8x8x8xf32> to vector<2x8x8xf32>
    %64 = vector.shape_cast %63 : vector<2x8x8xf32> to vector<16x8xf32>
    %65 = tpu.concatenate %58, %60, %62, %64 in 1 : vector<16x8xf32>, vector<16x8xf32>, vector<16x8xf32>, vector<16x8xf32> -> vector<16x32xf32>
    %c0_15 = arith.constant 0 : index
    %c0_16 = arith.constant 0 : index
    %66 = vector.load %arg4[%c0_15, %c0_16] : memref<32x32xf32, #tpu.memory_space<vmem>>, vector<32x32xf32>
    %cst_17 = arith.constant dense<0.000000e+00> : vector<16x32xf32>
    %67 = tpu.matmul %65, %66, %cst_17 {dimension_numbers = #tpu.dot_dimension_numbers<[1], [0], [0], [1], [0, 0, 1, 1], [], []>} : vector<16x32xf32>, vector<32x32xf32>, vector<16x32xf32> -> vector<16x32xf32>
    %68 = arith.addf %0, %67 : vector<16x32xf32>
    %c0_18 = arith.constant 0 : index
    %c0_19 = arith.constant 0 : index
    %69 = vector.load %arg6[%c0_18, %c0_19] : memref<16x32xf32, #tpu.memory_space<vmem>>, vector<16x32xf32>
    tpu.vector_store %arg6[%c0_18, %c0_19], %68 {strides = array<i32>} : memref<16x32xf32, #tpu.memory_space<vmem>>, vector<16x32xf32>,
    return
  }
  func.func @transform_0(%arg0: i32) -> (i32, i32) {
    %c0_i32 = arith.constant 0 : i32
    %c0_i32_0 = arith.constant 0 : i32
    %c0_i32_1 = arith.constant 0 : i32
    return %c0_i32, %c0_i32_0 : i32, i32
  }
  func.func @transform_1(%arg0: i32) -> (i32, i32) {
    %c0_i32 = arith.constant 0 : i32
    %c0_i32_0 = arith.constant 0 : i32
    %c0_i32_1 = arith.constant 0 : i32
    return %c0_i32, %c0_i32_0 : i32, i32
  }
  func.func @transform_2(%arg0: i32) -> (i32, i32) {
    %c0_i32 = arith.constant 0 : i32
    %c0_i32_0 = arith.constant 0 : i32
    %c0_i32_1 = arith.constant 0 : i32
    return %c0_i32, %c0_i32_0 : i32, i32
  }
  func.func @transform_3(%arg0: i32) -> (i32, i32) {
    %c0_i32 = arith.constant 0 : i32
    %c0_i32_0 = arith.constant 0 : i32
    %c0_i32_1 = arith.constant 0 : i32
    return %c0_i32, %c0_i32_0 : i32, i32
  }
  func.func @transform_4(%arg0: i32) -> (i32, i32, i32) {
    %c0_i32 = arith.constant 0 : i32
    %c0_i32_0 = arith.constant 0 : i32
    %c0_i32_1 = arith.constant 0 : i32
    %c0_i32_2 = arith.constant 0 : i32
    return %c0_i32, %c0_i32_0, %c0_i32_1 : i32, i32, i32
  }
  func.func @transform_5(%arg0: i32) -> (i32, i32) {
    %c0_i32 = arith.constant 0 : i32
    %c0_i32_0 = arith.constant 0 : i32
    %c0_i32_1 = arith.constant 0 : i32
    return %c0_i32, %c0_i32_0 : i32, i32
  }
}

</mosaic_0001>

<bundles_post_ra>
// kernel: tpu_custom_call.1
= control target key start
LH: loop header
LB: loop body
LE: loop exit
PB: predicated region body
PF: predicated region fallthrough
CT: control target
= control target key end

     0   :  { %10 = vsyncpa [#allocation3], 0  ;;  %s2253_s0 = inlined_call_operand.hbm [shape: f32[16,32], index: 0, kind: input, shape index: {}]   ;;  %s2254_s1 = inlined_call_operand.vmem [shape: f32[1,32], index: 1, kind: input, shape index: {}]   ;;  %s2255_s2 = inlined_call_operand.hbm [shape: f32[32,96], index: 2, kind: input, shape index: {}]   ;;  %s2256_s3 = inlined_call_operand.hbm [shape: f32[32,32], index: 3, kind: input, shape index: {}]   ;;  %s2257_s4 = inlined_call_operand.hbm [shape: f32[8,8,8], index: 4, kind: input, shape index: {}]   ;;  %s2258_s5 = inlined_call_operand.hbm [shape: f32[16,32], index: 5, kind: output, shape index: {}]  }
   0x1   :  { %11 = vsyncpa [#allocation6], 0 }
   0x2   :  { %12 = vsyncpa [#allocation9], 0 }
   0x3   :  { %13 = vsyncpa [#allocation4], 0  ;;  %s1992_s18 = smov [#allocation5]   ;;  %s1993_s20 = smov [#allocation2]  }
   0x4   :  { %s33_s19 = sshll.u32 %s1992_s18, 4  ;;  %s19_s21 = sshll.u32 %s1993_s20, 4  ;;  %s34_s19 = int_to_ptr.vmem [resolvable:$true] %s33_s19  ;;  %s20_s21 = int_to_ptr.vmem [resolvable:$true] %s19_s21 }
   0x5   :  { %s1892_s22 = scalar_lea.vmem %s34_s19, 512  ;;  %p1897_p1 = scmp.lt.s32.totalorder %s34_s19, %s34_s19 }
   0x6   :  { %p1893_p0 = scmp.ne.s32.totalorder %s34_s19, %s1892_s22  ;;  %p1898_p2 = scmp.lt.s32.totalorder %s1892_s22, %s1892_s22 }
   0x8   :  { %p1899_p3 = por %p1898_p2, %p1897_p1 }
   0xa   :  { %p1900_p4 = pnand %p1899_p3, %p1893_p0 }
   0xc   :  { %1903 = shalt.err (!%p1900_p4)
}
   0xd   :  { %s1994_s23 = smov 128   ;;  %s1995_s24 = smov 8  }
   0xe   :  { %39 = dma.hbm_to_vmem [thread:$0]  %s2255_s2, 512, %s34_s19, [#allocation6], %s1994_s23, %s1994_s23, %s1995_s24  }
   0xf   :  { %s1912_s27 = scalar_lea.vmem %s20_s21, 256  ;;  %p1917_p6 = scmp.lt.s32.totalorder %s20_s21, %s20_s21 }
  0x10   :  { %p1913_p5 = scmp.ne.s32.totalorder %s20_s21, %s1912_s27  ;;  %p1918_p7 = scmp.lt.s32.totalorder %s1912_s27, %s1912_s27 }
  0x12   :  { %p1919_p8 = por %p1918_p7, %p1917_p6 }
  0x14   :  { %p1920_p9 = pnand %p1919_p8, %p1913_p5 }
  0x16   :  { %1923 = shalt.err (!%p1920_p9)
}
  0x17   :  { %25 = dma.hbm_to_vmem [thread:$0]  %s2253_s0, 256, %s20_s21, [#allocation3], %s1994_s23, %s1994_s23, %s1995_s24  }
  0x18   :  { %s1996_s30 = smov [#allocation7]   ;;  %s1997_s7 = smov [#allocation8]  }
  0x19   :  { %s45_s6 = sshll.u32 %s1996_s30, 4  ;;  %s57_s8 = sshll.u32 %s1997_s7, 4  ;;  %s46_s6 = int_to_ptr.vmem [resolvable:$true] %s45_s6  ;;  %s58_s8 = int_to_ptr.vmem [resolvable:$true] %s57_s8 }
  0x1a   :  { %s1932_s2 = scalar_lea.vmem %s46_s6, 512  ;;  %p1937_p11 = scmp.lt.s32.totalorder %s46_s6, %s46_s6 }
  0x1b   :  { %p1933_p10 = scmp.ne.s32.totalorder %s46_s6, %s1932_s2  ;;  %p1938_p12 = scmp.lt.s32.totalorder %s1932_s2, %s1932_s2 }
  0x1d   :  { %p1939_p13 = por %p1938_p12, %p1937_p11 }
  0x1f   :  { %p1940_p0 = pnand %p1939_p13, %p1933_p10 }
  0x21   :  { %1943 = shalt.err (!%p1940_p0)
}
  0x22   :  { %51 = dma.hbm_to_vmem [thread:$0]  %s2256_s3, 512, %s46_s6, [#allocation6], %s1994_s23, %s1994_s23, %s1995_s24  }
  0x23   :  { %s1952_s0 = scalar_lea.vmem %s58_s8, 1024  ;;  %p1957_p2 = scmp.lt.s32.totalorder %s58_s8, %s58_s8 }
  0x24   :  { %p1953_p1 = scmp.ne.s32.totalorder %s58_s8, %s1952_s0  ;;  %p1958_p3 = scmp.lt.s32.totalorder %s1952_s0, %s1952_s0 }
  0x26   :  { %p1959_p4 = por %p1958_p3, %p1957_p2 }
  0x28   :  { %p1960_p5 = pnand %p1959_p4, %p1953_p1 }
  0x2a   :  { %1963 = shalt.err (!%p1960_p5)
}
  0x2b   :  { %63 = dma.hbm_to_vmem [thread:$0]  %s2257_s4, 1024, %s58_s8, [#allocation9], %s1994_s23, %s1994_s23, %s1995_s24  }
  0x2c   :  { %1984 = dma.done.wait [#allocation3], 256  }
  0x2d   :  { %1985 = vsyncadd [#allocation3], 4294967040 }
  0x2e   :  { %1986 = dma.done.wait [#allocation6], 1024  }
  0x2f   :  { %1987 = vsyncadd [#allocation6], 4294966272 }
  0x30   :  { %1988 = dma.done.wait [#allocation9], 1024  }
  0x31   :  { %1989 = vsyncadd [#allocation9], 4294966272  ;;  %v2062_v0 = vld [vmem:[#allocation2] sm:$0xff]  ;;  %vm80_vm0 = vcmask 261120   ;;  %v2064_v1 = vld [vmem:[#allocation2 + $0x8] sm:$0xff]  ;;  %s1998_s13 = smov 120  }
  0x32   :  { %v78_v2 = vmul.f32 %v2062_v0, %v2062_v0  ;;  %v79_v3 = vmul.f32 %v2064_v1, %v2064_v1  ;;  %v108_v6 = vld [vmem:[#allocation5 + $0x18] sm:$0xff]  ;;  %v107_v7 = vld [vmem:[#allocation5 + $0x10] sm:$0xff]  ;;  %v106_v8 = vld [vmem:[#allocation5 + $0x8] sm:$0xff]  ;;  %s1999_s14 = smov 112   ;;  %v2000_v25 = vmov 0.0   ;;  %vm2001_vm1 = vmmov 0  }
  0x33   :  { %1730 = vmatprep.subr.mxu0 %v108_v6  ;;  %v105_v9 = vld [vmem:[#allocation5] sm:$0xff]  ;;  %v1657_v17 = vld [vmem:[%s2254_s1] ss:$0 sm:$0xff]  ;;  %1741 = vmatprep.subr.mxu1 %v2000_v25  ;;  %s2002_s1 = smov 104   ;;  %s2003_s15 = smov 96   ;;  %vm214_vm2 = vcmask 64512  }
  0x34   :  { %v81_v4 = vsel %vm80_vm0, %v78_v2, 0.0  ;;  %v84_v5 = vsel %vm80_vm0, %v79_v3, 0.0  ;;  %1731 = vmatpush3.msra.mxu0 %v108_v6  ;;  %1743 = vmatprep.mubr.msk.f32.mxu1 %vm2001_vm1, %v2000_v25  ;;  %v204_v40 = vld [vmem:[#allocation8] sm:$0xff]  ;;  %v205_v44 = vld [vmem:[#allocation8 + $0x8] sm:$0xff]  ;;  %v206_v50 = vld [vmem:[#allocation8 + $0x10] sm:$0xff]  ;;  %s2004_s16 = smov 64  }
  0x35   :  { %82 = vadd.xlane.f32.xlu0 %v81_v4  ;;  %1732 = vmatprep.subr.mxu0 %v107_v7  ;;  %v207_v54 = vld [vmem:[#allocation8 + $0x18] sm:$0xff]  ;;  %v208_v55 = vld [vmem:[#allocation8 + $0x20] sm:$0xff]  ;;  %v209_v63 = vld [vmem:[#allocation8 + $0x28] sm:$0xff]  ;;  %s2005_s17 = smov 16   ;;  %s2006_s18 = smov 24   ;;  %vm1543_vm3 = vcmask 130048  }
  0x36   :  { %1733 = vmatpush3.msra.mxu0 %v107_v7  ;;  %v210_v2 = vld [vmem:[#allocation8 + $0x30] sm:$0xff]  ;;  %vm1546_vm4 = vcmask 195584   ;;  %s2007_s19 = smov [#allocation10]  }
  0x37   :  { %1734 = vmatprep.subr.mxu0 %v106_v8  ;;  %s1643_s20 = sshll.u32 %s2007_s19, 4  ;;  %s1644_s20 = int_to_ptr.vmem [resolvable:$true] %s1643_s20 }
  0x38   :  { %1735 = vmatpush3.msra.mxu0 %v106_v8  ;;  %s1964_s21 = scalar_lea.vmem %s1644_s20, 256  ;;  %p1969_p7 = scmp.lt.s32.totalorder %s1644_s20, %s1644_s20 }
  0x39   :  { %85 = vadd.xlane.f32.xlu0 %v84_v5  ;;  %1736 = vmatprep.subr.mxu0 %v105_v9  ;;  %p1965_p6 = scmp.ne.s32.totalorder %s1644_s20, %s1964_s21  ;;  %p1970_p8 = scmp.lt.s32.totalorder %s1964_s21, %s1964_s21 }
  0x3a   :  { %1737 = vmatpush3.msra.mxu0 %v105_v9 }
  0x3b   :  { %1761 = vmatprep.subr.mxu0 %v2000_v25  ;;  %p1971_p9 = por %p1970_p8, %p1969_p7 }
  0x3d   :  { %p1972_p10 = pnand %p1971_p9, %p1965_p6 }
  0xbe   :  { %v83_v10 = vpop.xlane.xlu0 %82 }
  0xbf   :  { %v88_v11 = vmul.f32 0.03125, %v83_v10 }
  0xc1   :  { %v90_v12 = vadd.f32 1e-06, %v88_v11  ;;  %v211_v11 = vld [vmem:[#allocation8 + $0x38] sm:$0xff] }
  0xc2   :  { %v86_v13 = vpop.xlane.xlu0 %85 }
  0xc3   :  { %1848 = vrsqrt.f32 %v90_v12  ;;  %v89_v14 = vmul.f32 0.03125, %v86_v13 }
  0xc5   :  { %v91_v15 = vadd.f32 1e-06, %v89_v14 }
  0xc7   :  { %1850 = vrsqrt.f32 %v91_v15 }
  0xd0   :  { %v1849_v16 = vpop.eup %1848 }
  0xd1   :  { %v94_v18 = vmul.f32 %v1849_v16, %v2062_v0 }
  0xd3   :  { %v103_v19 = vmul.f32 %v1657_v17, %v94_v18 }
  0xd4   :  { %v1851_v20 = vpop.eup %1850 }
  0xd5   :  { %v95_v21 = vmul.f32 %v1851_v20, %v2064_v1  ;;  %1738 = vmatprep.mubr.msk.f32.mxu0 %vm80_vm0, %v103_v19 }
  0xd7   :  { %v104_v22 = vmul.f32 %v1657_v17, %v95_v21 }
  0xd9   :  { %1739 = vmatmul.mubr.msk.f32.vlgmr.msra.gmra.mxu0 %vm80_vm0, %v104_v22 }
  0xda   :  { %1763 = vmatprep.mubr.msk.f32.mxu0 %vm2001_vm1, %v2000_v25 }
 0x199   :  { %v2079_v23 = vpop.f32.mrf.mxu0 }
 0x19a   :  { %194 = vrot.lane.b32.xlu1 %v2079_v23, %s1998_s13 }
 0x19b   :  { %v2082_v24 = vpop.f32.mrf.mxu0 }
 0x19c   :  { %196 = vrot.lane.b32.xlu0 %v2082_v24, %s1999_s14 }
 0x19e   :  { %192 = vrot.lane.b32.xlu1 %v2082_v24, %s1998_s13 }
 0x1a2   :  { %198 = vrot.lane.b32.xlu1 %v2079_v23, %s1999_s14 }
 0x1a6   :  { %200 = vrot.lane.b32.xlu1 %v2082_v24, %s2002_s1 }
 0x1aa   :  { %202 = vrot.lane.b32.xlu1 %v2079_v23, %s2002_s1 }
 0x1ae   :  { %212 = vrot.lane.b32.xlu1 %v2082_v24, %s2003_s15 }
 0x1b2   :  { %289 = vrot.lane.b32.xlu1 %v2079_v23, %s2003_s15 }
 0x20c   :  { %v2097_v26 = vpop.permute.xlu1 %194 }
 0x20d   :  { %441 = vrot.lane.b32.xlu0 %v2097_v26, %s2003_s15 }
 0x20e   :  { %v2103_v28 = vpop.permute.xlu0 %196 }
 0x210   :  { %v2100_v27 = vpop.permute.xlu1 %192 }
 0x211   :  { %365 = vrot.lane.b32.xlu1 %v2100_v27, %s2003_s15 }
 0x214   :  { %v2105_v29 = vpop.permute.xlu1 %198 }
 0x215   :  { %517 = vrot.lane.b32.xlu1 %v2103_v28, %s2003_s15  ;;  %593 = vrot.lane.b32.xlu0 %v2105_v29, %s2003_s15 }
 0x218   :  { %v2109_v30 = vpop.permute.xlu1 %200 }
 0x219   :  { %669 = vrot.lane.b32.xlu1 %v2109_v30, %s2003_s15 }
 0x21c   :  { %v2112_v31 = vpop.permute.xlu1 %202 }
 0x21d   :  { %745 = vrot.lane.b32.xlu0 %v2112_v31, %s2003_s15 }
 0x220   :  { %v213_v32 = vpop.permute.xlu1 %212 }
 0x221   :  { %1742 = vmatpush3.xpose.msk.msra.mxu1 %vm214_vm2, %v213_v32 }
 0x222   :  { %1746 = vmatprep.subr.mxu1 %v2000_v25 }
 0x224   :  { %1744 = vmatmul.mubr.msk.f32.vlgmr.msra.gmra.mxu1 %vm214_vm2, %v2082_v24  ;;  %v290_v33 = vpop.permute.xlu1 %289 }
 0x225   :  { %1747 = vmatpush3.xpose.msk.msra.mxu1 %vm214_vm2, %v290_v33  ;;  %1748 = vmatprep.mubr.msk.f32.mxu1 %vm2001_vm1, %v2000_v25 }
 0x226   :  { %1751 = vmatprep.subr.mxu1 %v2000_v25 }
 0x228   :  { %1749 = vmatmul.mubr.msk.f32.vlgmr.msra.gmra.mxu1 %vm214_vm2, %v2079_v23 }
 0x229   :  { %1753 = vmatprep.mubr.msk.f32.mxu1 %vm2001_vm1, %v2000_v25 }
 0x27f   :  { %v442_v35 = vpop.permute.xlu0 %441 }
 0x283   :  { %v366_v34 = vpop.permute.xlu1 %365 }
 0x284   :  { %1752 = vmatpush3.xpose.msk.msra.mxu1 %vm214_vm2, %v366_v34 }
 0x285   :  { %1756 = vmatprep.subr.mxu1 %v2000_v25 }
 0x287   :  { %1754 = vmatmul.mubr.msk.f32.vlgmr.msra.gmra.mxu1 %vm214_vm2, %v2100_v27  ;;  %v518_v36 = vpop.permute.xlu1 %517  ;;  %v594_v37 = vpop.permute.xlu0 %593 }
 0x288   :  { %1757 = vmatpush3.xpose.msk.msra.mxu1 %vm214_vm2, %v442_v35  ;;  %1762 = vmatpush3.xpose.msk.msra.mxu0 %vm214_vm2, %v518_v36 }
 0x289   :  { %1758 = vmatprep.mubr.msk.f32.mxu1 %vm2001_vm1, %v2000_v25  ;;  %1766 = vmatprep.subr.mxu1 %v2000_v25 }
 0x28a   :  { %1771 = vmatprep.subr.mxu0 %v2000_v25 }
 0x28b   :  { %1759 = vmatmul.mubr.msk.f32.vlgmr.msra.gmra.mxu1 %vm214_vm2, %v2097_v26  ;;  %1764 = vmatmul.mubr.msk.f32.vlgmr.msra.gmra.mxu0 %vm214_vm2, %v2103_v28  ;;  %v670_v38 = vpop.permute.xlu1 %669 }
 0x28c   :  { %1767 = vmatpush3.xpose.msk.msra.mxu1 %vm214_vm2, %v594_v37  ;;  %1772 = vmatpush3.xpose.msk.msra.mxu0 %vm214_vm2, %v670_v38 }
 0x28d   :  { %1768 = vmatprep.mubr.msk.f32.mxu1 %vm2001_vm1, %v2000_v25  ;;  %1773 = vmatprep.mubr.msk.f32.mxu0 %vm2001_vm1, %v2000_v25 }
 0x28e   :  { %1776 = vmatprep.subr.mxu1 %v2000_v25  ;;  %1781 = vmatprep.subr.mxu0 %v2000_v25 }
 0x28f   :  { %v746_v39 = vpop.permute.xlu0 %745  ;;  %1769 = vmatmul.mubr.msk.f32.vlgmr.msra.gmra.mxu1 %vm214_vm2, %v2105_v29  ;;  %1774 = vmatmul.mubr.msk.f32.vlgmr.msra.gmra.mxu0 %vm214_vm2, %v2109_v30 }
 0x290   :  { %1777 = vmatpush3.xpose.msk.msra.mxu1 %vm214_vm2, %v746_v39  ;;  %1778 = vmatprep.mubr.msk.f32.mxu1 %vm2001_vm1, %v2000_v25 }
 0x291   :  { %1786 = vmatprep.subr.mxu1 %v2000_v25  ;;  %1783 = vmatprep.mubr.msk.f32.mxu0 %vm2001_vm1, %v2000_v25 }
 0x293   :  { %1779 = vmatmul.mubr.msk.f32.vlgmr.msra.gmra.mxu1 %vm214_vm2, %v2112_v31 }
 0x294   :  { %1788 = vmatprep.mubr.msk.f32.mxu1 %vm2001_vm1, %v2000_v25 }
 0x2e4   :  { %v285_v41 = vpop.f32.mrf.mxu1 }
 0x2e5   :  { %v286_v42 = vadd.f32 %v285_v41, %v204_v40 }
 0x2e6   :  { %v1745_v43 = vpop.f32.mrf.mxu1 }
 0x2e7   :  { %v821_v45 = vsel %vm214_vm2, %v286_v42, -inf }
 0x2e8   :  { %822 = vmax.xlane.f32.xlu1 %v821_v45  ;;  %v361_v46 = vpop.f32.mrf.mxu1 }
 0x2e9   :  { %v362_v47 = vadd.f32 %v361_v46, %v205_v44 }
 0x2ea   :  { %v1750_v48 = vpop.f32.mrf.mxu1 }
 0x2eb   :  { %v824_v49 = vsel %vm214_vm2, %v362_v47, -inf }
 0x2ec   :  { %825 = vmax.xlane.f32.xlu0 %v824_v49 }
 0x347   :  { %v437_v51 = vpop.f32.mrf.mxu1 }
 0x348   :  { %v438_v52 = vadd.f32 %v437_v51, %v206_v50 }
 0x349   :  { %v1755_v53 = vpop.f32.mrf.mxu1 }
 0x34a   :  { %v827_v56 = vsel %vm214_vm2, %v438_v52, -inf }
 0x34b   :  { %828 = vmax.xlane.f32.xlu0 %v827_v56  ;;  %v513_v57 = vpop.f32.mrf.mxu1  ;;  %v589_v58 = vpop.f32.mrf.mxu0 }
 0x34c   :  { %v514_v59 = vadd.f32 %v513_v57, %v207_v54  ;;  %v590_v60 = vadd.f32 %v589_v58, %v208_v55 }
 0x34d   :  { %v1760_v61 = vpop.f32.mrf.mxu1  ;;  %v1765_v62 = vpop.f32.mrf.mxu0 }
 0x34e   :  { %v830_v3 = vsel %vm214_vm2, %v514_v59, -inf  ;;  %v833_v4 = vsel %vm214_vm2, %v590_v60, -inf }
 0x34f   :  { %831 = vmax.xlane.f32.xlu1 %v830_v3  ;;  %v665_v5 = vpop.f32.mrf.mxu1  ;;  %834 = vmax.xlane.f32.xlu0 %v833_v4  ;;  %v741_v6 = vpop.f32.mrf.mxu0 }
 0x350   :  { %v666_v7 = vadd.f32 %v665_v5, %v209_v63  ;;  %v742_v8 = vadd.f32 %v741_v6, %v210_v2 }
 0x351   :  { %v1770_v9 = vpop.f32.mrf.mxu1  ;;  %v1775_v10 = vpop.f32.mrf.mxu0 }
 0x352   :  { %v836_v12 = vsel %vm214_vm2, %v666_v7, -inf  ;;  %v839_v13 = vsel %vm214_vm2, %v742_v8, -inf }
 0x353   :  { %837 = vmax.xlane.f32.xlu1 %v836_v12  ;;  %v817_v14 = vpop.f32.mrf.mxu1  ;;  %840 = vmax.xlane.f32.xlu0 %v839_v13 }
 0x354   :  { %v818_v15 = vadd.f32 %v817_v14, %v211_v11 }
 0x355   :  { %v1780_v16 = vpop.f32.mrf.mxu1 }
 0x356   :  { %v842_v17 = vsel %vm214_vm2, %v818_v15, -inf }
 0x357   :  { %843 = vmax.xlane.f32.xlu1 %v842_v17 }
 0x368   :  { %985 = vrot.lane.b32.xlu1 %v2079_v23, %s2004_s16 }
 0x369   :  { %909 = vrot.lane.b32.xlu0 %v2082_v24, %s2004_s16 }
 0x36c   :  { %1061 = vrot.lane.b32.xlu1 %v2100_v27, %s2004_s16 }
 0x36d   :  { %1137 = vrot.lane.b32.xlu0 %v2097_v26, %s2004_s16 }
 0x370   :  { %1213 = vrot.lane.b32.xlu1 %v2103_v28, %s2004_s16 }
 0x371   :  { %1289 = vrot.lane.b32.xlu0 %v2105_v29, %s2004_s16  ;;  %v823_v18 = vpop.xlane.xlu1 %822 }
 0x372   :  { %v845_v19 = vsub.f32 %v286_v42, %v823_v18 }
 0x374   :  { %v853_v21 = vmul.f32 1.442695, %v845_v19 }
 0x375   :  { %v826_v20 = vpop.xlane.xlu0 %825 }
 0x376   :  { %v846_v22 = vsub.f32 %v362_v47, %v826_v20  ;;  %1852 = vpow2.f32 %v853_v21 }
 0x378   :  { %v855_v23 = vmul.f32 1.442695, %v846_v22 }
 0x37a   :  { %1854 = vpow2.f32 %v855_v23 }
 0x383   :  { %v2183_v24 = vpop.eup %1852 }
 0x384   :  { %v869_v27 = vsel %vm214_vm2, %v2183_v24, 0.0 }
 0x387   :  { %v2187_v26 = vpop.eup %1854 }
 0x388   :  { %v872_v28 = vsel %vm214_vm2, %v2187_v26, 0.0 }
 0x390   :  { %870 = vadd.xlane.f32.xlu0 %v869_v27 }
 0x394   :  { %873 = vadd.xlane.f32.xlu1 %v872_v28 }
 0x3d4   :  { %v829_v29 = vpop.xlane.xlu0 %828 }
 0x3d5   :  { %v847_v32 = vsub.f32 %v438_v52, %v829_v29 }
 0x3d7   :  { %v857_v33 = vmul.f32 1.442695, %v847_v32 }
 0x3d8   :  { %v835_v34 = vpop.xlane.xlu0 %834  ;;  %v832_v35 = vpop.xlane.xlu1 %831 }
 0x3d9   :  { %1856 = vpow2.f32 %v857_v33  ;;  %v849_v36 = vsub.f32 %v590_v60, %v835_v34  ;;  %v848_v37 = vsub.f32 %v514_v59, %v832_v35 }
 0x3db   :  { %v861_v38 = vmul.f32 1.442695, %v849_v36  ;;  %v859_v39 = vmul.f32 1.442695, %v848_v37  ;;  %v1552_v36 = vld [vmem:[#allocation7 + $0x18] sm:$0xff]  ;;  %v1551_v37 = vld [vmem:[#allocation7 + $0x10] sm:$0xff] }
 0x3dc   :  { %v841_v40 = vpop.xlane.xlu0 %840  ;;  %v838_v41 = vpop.xlane.xlu1 %837 }
 0x3dd   :  { %1858 = vpow2.f32 %v861_v38  ;;  %v851_v42 = vsub.f32 %v742_v8, %v841_v40  ;;  %v850_v43 = vsub.f32 %v666_v7, %v838_v41  ;;  %v1550_v38 = vld [vmem:[#allocation7 + $0x8] sm:$0xff]  ;;  %v1549_v40 = vld [vmem:[#allocation7] sm:$0xff] }
 0x3de   :  { %1860 = vpow2.f32 %v859_v39 }
 0x3df   :  { %v865_v44 = vmul.f32 1.442695, %v851_v42  ;;  %v863_v45 = vmul.f32 1.442695, %v850_v43 }
 0x3e0   :  { %v910_v46 = vpop.permute.xlu0 %909  ;;  %v844_v47 = vpop.xlane.xlu1 %843 }
 0x3e1   :  { %1862 = vpow2.f32 %v865_v44  ;;  %v852_v48 = vsub.f32 %v818_v15, %v844_v47  ;;  %1782 = vmatpush3.msra.mxu0 %v910_v46 }
 0x3e2   :  { %1864 = vpow2.f32 %v863_v45  ;;  %1791 = vmatprep.subr.mxu0 %v2000_v25 }
 0x3e3   :  { %v867_v49 = vmul.f32 1.442695, %v852_v48 }
 0x3e4   :  { %v986_v50 = vpop.permute.xlu1 %985  ;;  %v1138_v63 = vpop.permute.xlu0 %1137 }
 0x3e5   :  { %1866 = vpow2.f32 %v867_v49  ;;  %1787 = vmatpush3.msra.mxu1 %v986_v50 }
 0x3e6   :  { %v1857_v51 = vpop.eup %1856  ;;  %1796 = vmatprep.subr.mxu1 %v2000_v25 }
 0x3e7   :  { %v875_v52 = vsel %vm214_vm2, %v1857_v51, 0.0 }
 0x3e8   :  { %876 = vadd.xlane.f32.xlu0 %v875_v52  ;;  %v1062_v2 = vpop.permute.xlu1 %1061  ;;  %v1290_v3 = vpop.permute.xlu0 %1289 }
 0x3ea   :  { %v1859_v53 = vpop.eup %1858 }
 0x3eb   :  { %v1861_v54 = vpop.eup %1860  ;;  %v881_v55 = vsel %vm214_vm2, %v1859_v53, 0.0 }
 0x3ec   :  { %882 = vadd.xlane.f32.xlu0 %v881_v55  ;;  %v878_v56 = vsel %vm214_vm2, %v1861_v54, 0.0  ;;  %v1214_v4 = vpop.permute.xlu1 %1213 }
 0x3ed   :  { %879 = vadd.xlane.f32.xlu1 %v878_v56 }
 0x3ee   :  { %v1863_v57 = vpop.eup %1862 }
 0x3ef   :  { %v2196_v58 = vpop.eup %1864  ;;  %v887_v59 = vsel %vm214_vm2, %v1863_v57, 0.0 }
 0x3f0   :  { %888 = vadd.xlane.f32.xlu0 %v887_v59  ;;  %v884_v60 = vsel %vm214_vm2, %v2196_v58, 0.0 }
 0x3f1   :  { %885 = vadd.xlane.f32.xlu1 %v884_v60 }
 0x3f2   :  { %v2201_v61 = vpop.eup %1866 }
 0x3f3   :  { %v890_v62 = vsel %vm214_vm2, %v2201_v61, 0.0 }
 0x3f5   :  { %891 = vadd.xlane.f32.xlu1 %v890_v62 }
 0x406   :  { %1365 = vrot.lane.b32.xlu1 %v2109_v30, %s2004_s16  ;;  %1441 = vrot.lane.b32.xlu0 %v2112_v31, %s2004_s16 }
 0x419   :  { %v871_v5 = vpop.xlane.xlu0 %870 }
 0x41a   :  { %1868 = vrcp.f32 %v871_v5 }
 0x41d   :  { %v874_v6 = vpop.xlane.xlu1 %873 }
 0x41e   :  { %1870 = vrcp.f32 %v874_v6 }
 0x427   :  { %v1869_v7 = vpop.eup %1868 }
 0x428   :  { %v901_v8 = vmul.f32 %v1869_v7, %v2183_v24 }
 0x42a   :  { %1784 = vmatmul.mubr.msk.f32.vlgmr.msra.gmra.mxu0 %vm214_vm2, %v901_v8 }
 0x42b   :  { %v1871_v9 = vpop.eup %1870  ;;  %1792 = vmatpush3.msra.mxu0 %v1062_v2  ;;  %1793 = vmatprep.mubr.msk.f32.mxu0 %vm2001_vm1, %v2000_v25 }
 0x42c   :  { %v902_v30 = vmul.f32 %v1871_v9, %v2187_v26  ;;  %1801 = vmatprep.subr.mxu0 %v2000_v25 }
 0x42e   :  { %1789 = vmatmul.mubr.msk.f32.vlgmr.msra.gmra.mxu1 %vm214_vm2, %v902_v30 }
 0x42f   :  { %1797 = vmatpush3.msra.mxu1 %v1138_v63  ;;  %1798 = vmatprep.mubr.msk.f32.mxu1 %vm2001_vm1, %v2000_v25 }
 0x430   :  { %1806 = vmatprep.subr.mxu1 %v2000_v25 }
 0x471   :  { %v877_v31 = vpop.xlane.xlu0 %876 }
 0x472   :  { %1872 = vrcp.f32 %v877_v31 }
 0x475   :  { %v883_v10 = vpop.xlane.xlu0 %882 }
 0x476   :  { %1874 = vrcp.f32 %v883_v10  ;;  %v880_v11 = vpop.xlane.xlu1 %879 }
 0x477   :  { %1876 = vrcp.f32 %v880_v11 }
 0x479   :  { %v889_v12 = vpop.xlane.xlu0 %888 }
 0x47a   :  { %1878 = vrcp.f32 %v889_v12  ;;  %v886_v13 = vpop.xlane.xlu1 %885 }
 0x47b   :  { %1880 = vrcp.f32 %v886_v13 }
 0x47d   :  { %v1442_v26 = vpop.permute.xlu0 %1441 }
 0x47e   :  { %v892_v14 = vpop.xlane.xlu1 %891 }
 0x47f   :  { %v1873_v15 = vpop.eup %1872  ;;  %1882 = vrcp.f32 %v892_v14 }
 0x480   :  { %v903_v16 = vmul.f32 %v1873_v15, %v1857_v51 }
 0x482   :  { %1794 = vmatmul.mubr.msk.f32.vlgmr.msra.gmra.mxu0 %vm214_vm2, %v903_v16  ;;  %v1366_v21 = vpop.permute.xlu1 %1365 }
 0x483   :  { %v1875_v17 = vpop.eup %1874  ;;  %1802 = vmatpush3.msra.mxu0 %v1214_v4  ;;  %1803 = vmatprep.mubr.msk.f32.mxu0 %vm2001_vm1, %v2000_v25 }
 0x484   :  { %v1877_v18 = vpop.eup %1876  ;;  %1811 = vmatprep.subr.mxu0 %v2000_v25  ;;  %v905_v19 = vmul.f32 %v1875_v17, %v1859_v53 }
 0x485   :  { %v904_v20 = vmul.f32 %v1877_v18, %v1861_v54 }
 0x486   :  { %1804 = vmatmul.mubr.msk.f32.vlgmr.msra.gmra.mxu0 %vm214_vm2, %v905_v19 }
 0x487   :  { %v1879_v22 = vpop.eup %1878  ;;  %1799 = vmatmul.mubr.msk.f32.vlgmr.msra.gmra.mxu1 %vm214_vm2, %v904_v20  ;;  %1812 = vmatpush3.msra.mxu0 %v1366_v21 }
 0x488   :  { %v1881_v23 = vpop.eup %1880  ;;  %1807 = vmatpush3.msra.mxu1 %v1290_v3  ;;  %1808 = vmatprep.mubr.msk.f32.mxu1 %vm2001_vm1, %v2000_v25  ;;  %v907_v24 = vmul.f32 %v1879_v22, %v1863_v57 }
 0x489   :  { %1813 = vmatprep.mubr.msk.f32.mxu0 %vm2001_vm1, %v2000_v25  ;;  %1816 = vmatprep.subr.mxu1 %v2000_v25  ;;  %v906_v27 = vmul.f32 %v1881_v23, %v2196_v58 }
 0x48a   :  { %1814 = vmatmul.mubr.msk.f32.vlgmr.msra.gmra.mxu0 %vm214_vm2, %v907_v24  ;;  %1821 = vmatprep.subr.mxu0 %v1552_v36 }
 0x48b   :  { %1809 = vmatmul.mubr.msk.f32.vlgmr.msra.gmra.mxu1 %vm214_vm2, %v906_v27  ;;  %1822 = vmatpush3.msra.mxu0 %v1552_v36 }
 0x48c   :  { %v1883_v28 = vpop.eup %1882  ;;  %1817 = vmatpush3.msra.mxu1 %v1442_v26  ;;  %1818 = vmatprep.mubr.msk.f32.mxu1 %vm2001_vm1, %v2000_v25 }
 0x48d   :  { %v908_v29 = vmul.f32 %v1883_v28, %v2201_v61  ;;  %1823 = vmatprep.subr.mxu0 %v1551_v37 }
 0x48e   :  { %1824 = vmatpush3.msra.mxu0 %v1551_v37 }
 0x48f   :  { %1819 = vmatmul.mubr.msk.f32.vlgmr.msra.gmra.mxu1 %vm214_vm2, %v908_v29  ;;  %1825 = vmatprep.subr.mxu0 %v1550_v38 }
 0x490   :  { %1826 = vmatpush3.msra.mxu0 %v1550_v38 }
 0x491   :  { %1827 = vmatprep.subr.mxu0 %v1549_v40 }
 0x492   :  { %1828 = vmatpush3.msra.mxu0 %v1549_v40 }
 0x4ea   :  { %v981_v32 = vpop.f32.mrf.mxu0 }
 0x4ec   :  { %v1785_v33 = vpop.f32.mrf.mxu0 }
 0x4ee   :  { %v1057_v34 = vpop.f32.mrf.mxu1 }
 0x4f0   :  { %v1790_v35 = vpop.f32.mrf.mxu1 }
 0x542   :  { %v1133_v39 = vpop.f32.mrf.mxu0 }
 0x543   :  { %1519 = vrot.lane.b32.xlu1 %v1133_v39, %s1995_s24 }
 0x544   :  { %v1795_v25 = vpop.f32.mrf.mxu0 }
 0x546   :  { %v1285_v41 = vpop.f32.mrf.mxu0 }
 0x547   :  { %v1209_v42 = vpop.f32.mrf.mxu1  ;;  %1527 = vrot.lane.b32.xlu1 %v1285_v41, %s2005_s17 }
 0x548   :  { %1521 = vrot.lane.b32.xlu0 %v1209_v42, %s1995_s24  ;;  %v1805_v43 = vpop.f32.mrf.mxu0 }
 0x549   :  { %v1800_v44 = vpop.f32.mrf.mxu1 }
 0x54a   :  { %v1437_v45 = vpop.f32.mrf.mxu0 }
 0x54b   :  { %v1361_v46 = vpop.f32.mrf.mxu1  ;;  %1535 = vrot.lane.b32.xlu1 %v1437_v45, %s2006_s18 }
 0x54c   :  { %1529 = vrot.lane.b32.xlu0 %v1361_v46, %s2005_s17  ;;  %v1815_v47 = vpop.f32.mrf.mxu0 }
 0x54d   :  { %v1810_v48 = vpop.f32.mrf.mxu1 }
 0x54f   :  { %v1513_v49 = vpop.f32.mrf.mxu1 }
 0x550   :  { %1537 = vrot.lane.b32.xlu0 %v1513_v49, %s2006_s18 }
 0x551   :  { %v1820_v50 = vpop.f32.mrf.mxu1 }
 0x5b5   :  { %v1520_v51 = vpop.permute.xlu1 %1519 }
 0x5b6   :  { %v1541_v54 = vsel %vm214_vm2, %v981_v32, %v1520_v51 }
 0x5b9   :  { %v1528_v52 = vpop.permute.xlu1 %1527 }
 0x5ba   :  { %v1522_v53 = vpop.permute.xlu0 %1521  ;;  %v1544_v55 = vsel %vm1543_vm3, %v1541_v54, %v1528_v52 }
 0x5bb   :  { %v1542_v59 = vsel %vm214_vm2, %v1057_v34, %v1522_v53 }
 0x5bd   :  { %v1536_v56 = vpop.permute.xlu1 %1535 }
 0x5be   :  { %v1530_v57 = vpop.permute.xlu0 %1529  ;;  %v1547_v58 = vsel %vm1546_vm4, %v1544_v55, %v1536_v56 }
 0x5bf   :  { %1829 = vmatprep.mubr.msk.f32.mxu0 %vm80_vm0, %v1547_v58  ;;  %v1545_v60 = vsel %vm1543_vm3, %v1542_v59, %v1530_v57 }
 0x5c2   :  { %v1538_v61 = vpop.permute.xlu0 %1537 }
 0x5c3   :  { %v1548_v62 = vsel %vm1546_vm4, %v1545_v60, %v1538_v61 }
 0x5c4   :  { %1830 = vmatmul.mubr.msk.f32.vlgmr.msra.gmra.mxu0 %vm80_vm0, %v1548_v62 }
 0x684   :  { %v1831_v63 = vpop.f32.mrf.mxu0 }
 0x685   :  { %v1635_v2 = vadd.f32 %v1831_v63, %v2064_v1 }
 0x686   :  { %v1625_v3 = vpop.f32.mrf.mxu0 }
 0x687   :  { %1637 = vst.msk [vmem:[#allocation10 + $0x8] sm:$0xff] %vm80_vm0, %v1635_v2  ;;  %v1634_v4 = vadd.f32 %v1625_v3, %v2062_v0 }
 0x689   :  { %1636 = vst.msk [vmem:[#allocation10] sm:$0xff] %vm80_vm0, %v1634_v4 }
 0x68a   :  { %1975 = shalt.err (!%p1972_p10)
}
 0x68b   :  { %1649 = dma.vmem_to_hbm [thread:$0]  %s1644_s20, 256, %s2258_s5, [#allocation4], %s1994_s23, %s1994_s23, %s1995_s24  }
 0x68c   :  { %1990 = dma.done.wait [#allocation4], 256  }
 0x68d   :  { %1991 = vsyncadd [#allocation4], 4294967040 }
 0x68e   :  { %1653 = vsyncpa [#allocation3], 1 }
 0x68f   :  { %1654 = vsyncpa [#allocation6], 1 }
 0x690   :  { %1655 = vsyncpa [#allocation9], 1 }
 0x691   :  { %1656 = vsyncpa [#allocation4], 1 }

</bundles_post_ra>
